<compile_context>
chip_gen: v5e
topology: v5e:2x2
jax: 0.10.0
libtpu: 0.0.40
codegen_flags: <defaults>
</compile_context>

<pallas_src>
import math
import functools

import numpy as np
import jax
import jax.numpy as jnp
from jax.experimental import pallas as pl
from jax.experimental.pallas import tpu as pltpu


def _cdiv(a: int, b: int) -> int:
    return -(-a // b)


def _round_up(x: int, m: int) -> int:
    return _cdiv(x, m) * m


def _largest_divisor_leq(n: int, cap: int) -> int:
    for t in range(min(n, cap), 0, -1):
        if n % t == 0:
            return t
    return 1


# -----------------------------------------------------------------------------
# Kernel A: large-vocab path.  Table stays in HBM (pl.ANY); rows are gathered by
# per-token DMA; waits are aggregated per chunk and overlapped with the epilogue.
# -----------------------------------------------------------------------------
def _embed_kernel_hbm_gather(ids_ref, table_ref, pe_ref, out_ref,
                             rows_ref, sem_ref, *,
                             scale, tile_tokens, chunk_tokens, rpt, vocab,
                             seq_pad, lane_out):
    # ids_ref   : (B*S_pad,) int32 in SMEM (scalar prefetch)   -- addressing only
    # table_ref : (V, rpt, 128) in HBM (pl.ANY)                -- gathered row-by-row via DMA
    # pe_ref    : (1, tile_rows, 128) VMEM                     -- PE slab (resident across B)
    # out_ref   : (1, 1, tile_rows, lane_out) VMEM             -- output tile
    # rows_ref  : (tile_rows, 128) VMEM scratch (table dtype)  -- gathered embedding rows
    # sem_ref   : (n_chunks,) DMA semaphores                   -- ONE aggregate sem per chunk
    j = pl.program_id(0)                # sequence-tile index (outer / slow grid axis)
    b = pl.program_id(1)                # batch index (inner / fast axis -> PE stays resident)
    base = b * seq_pad + j * tile_tokens
    n_chunks = tile_tokens // chunk_tokens
    chunk_rows = chunk_tokens * rpt

    # ---- Phase 1: issue ALL row-gather DMAs up front (HBM table -> VMEM scratch).
    # Every DMA of chunk c signals sem_ref[c]; all SMEM id reads happen before any
    # wait (keeps SMEM sst->sld forwarding intact).
    for c in range(n_chunks):
        for i in range(chunk_tokens):
            t = c * chunk_tokens + i
            # nn.Embedding assumes in-range ids; clamp since there is no HW OOB check.
            tok = jnp.clip(ids_ref[base + t], 0, vocab - 1)
            pltpu.make_async_copy(
                table_ref.at[tok],                        # (rpt, 128) row of padded table
                rows_ref.at[pl.ds(t * rpt, rpt), :],      # this token's lane-dense slot
                sem_ref.at[c],
            ).start()

    # ---- Phase 2: per chunk, ONE aggregate wait (descriptor bytes == sum of the
    # chunk's row DMAs), then the f32 scale + PE epilogue and the output store for
    # that chunk while later chunks' gathers are still in flight.
    for c in range(n_chunks):
        r0 = c * chunk_rows
        chunk_view = rows_ref.at[pl.ds(r0, chunk_rows), :]
        pltpu.make_async_copy(chunk_view, chunk_view, sem_ref.at[c]).wait()

        emb = rows_ref[pl.ds(r0, chunk_rows), :].astype(jnp.float32)
        pe = pe_ref[0, pl.ds(r0, chunk_rows), :].astype(jnp.float32)
        res = emb * scale + pe            # Dropout(p=0.2) is identity in eval mode
        out_ref[0, 0, pl.ds(r0, chunk_rows), :] = res[:, :lane_out].astype(out_ref.dtype)


# -----------------------------------------------------------------------------
# Kernel B: small-vocab fast path.  Table is VMEM-resident (whole-array block,
# fetched once); rows are gathered with direct dynamic indexing (no DMAs).
# -----------------------------------------------------------------------------
def _embed_kernel_vmem_table(ids_ref, table_ref, pe_ref, out_ref, rows_ref, *,
                             scale, tile_tokens, rpt, vocab, seq_pad, lane_out):
    # table_ref : (V, rpt, 128) whole array resident in VMEM
    # rows_ref  : (tile_rows, 128) f32 VMEM scratch
    j = pl.program_id(0)
    b = pl.program_id(1)
    base = b * seq_pad + j * tile_tokens

    # Row gather via dynamic first-axis indexing; store offsets are static (unrolled).
    for i in range(tile_tokens):
        tok = jnp.clip(ids_ref[base + i], 0, vocab - 1)
        rows_ref[pl.ds(i * rpt, rpt), :] = table_ref[tok].astype(jnp.float32)

    emb = rows_ref[...]                                  # already f32
    pe = pe_ref[0].astype(jnp.float32)
    res = emb * scale + pe                               # Dropout identity in eval mode
    out_ref[0, 0] = res[:, :lane_out].astype(out_ref.dtype)


# -----------------------------------------------------------------------------
# Wrapper
# -----------------------------------------------------------------------------
def transformer_embedding(ids, embed_table, pe_full, *,
                          max_tile_tokens=128, chunk_tokens=16,
                          vmem_table_bytes_limit=8 * 1024 * 1024,
                          force_hbm_gather=False):
    """Forward pass of TransformerEmbedding (eval mode: dropout is identity).

    ids         : (B, S)    integer token ids
    embed_table : (V, D)    embedding weight (f32 or bf16 storage)
    pe_full     : (>=S, D)  positional-encoding buffer
    """
    B, S = ids.shape
    V, D = embed_table.shape
    assert pe_full.shape[0] >= S and pe_full.shape[1] == D

    dtype = embed_table.dtype
    itemsize = jnp.dtype(dtype).itemsize

    # Lane-dense internal layout: pad D up to a multiple of 128 -> rpt (rows/token).
    D_pad = _round_up(D, 128)
    rpt = D_pad // 128

    # Output lane width: write the true D directly when D <= 128 (avoids the
    # post-kernel out[..., :D] slice); D % 128 == 0 is already exact.
    if D % 128 == 0:
        lane_out = 128
    elif D < 128:
        lane_out = D
    else:
        lane_out = 128        # D > 128 and ragged: padded output + post-slice (rare)

    # Sequence tiling with minimal padding (handles prime / awkward S gracefully).
    n_tiles = max(1, _cdiv(S, max_tile_tokens))
    tile_tokens = _cdiv(S, n_tiles)
    S_pad = n_tiles * tile_tokens
    tile_rows = tile_tokens * rpt
    chunk_eff = _largest_divisor_leq(tile_tokens, chunk_tokens)
    n_chunks = tile_tokens // chunk_eff

    # ---- host-side packing (one time, tiny relative to the embedding traffic) ----
    ids_p = ids.astype(jnp.int32)
    if S_pad != S:
        ids_p = jnp.pad(ids_p, ((0, 0), (0, S_pad - S)))      # pad value 0 (valid id)
    ids_flat = ids_p.reshape(-1)

    pe = pe_full[:S].astype(dtype)
    pe = jnp.pad(pe, ((0, S_pad - S), (0, D_pad - D)))
    pe_in = pe.reshape(n_tiles, tile_rows, 128)                # lane-dense PE slabs

    table_p = embed_table
    if D_pad != D:
        table_p = jnp.pad(table_p, ((0, 0), (0, D_pad - D)))
    table_in = table_p.reshape(V, rpt, 128)

    scale = float(math.sqrt(D))          # scale by sqrt(embed_dim) (the real D)

    # VMEM footprint of the table if made resident (per-token slab padded to a full
    # (8,128)-equivalent 4 KiB tile when rpt is small).
    sublane_pack = max(1, 4 // itemsize) * 8
    table_vmem_bytes = V * _cdiv(rpt, sublane_pack) * sublane_pack * 128 * itemsize
    use_vmem_table = (not force_hbm_gather) and table_vmem_bytes <= vmem_table_bytes_limit

    out_shape = jax.ShapeDtypeStruct((B, n_tiles, tile_rows, lane_out), dtype)
    pe_spec = pl.BlockSpec((1, tile_rows, 128), lambda j, b, ids: (j, 0, 0))
    out_spec = pl.BlockSpec((1, 1, tile_rows, lane_out), lambda j, b, ids: (b, j, 0, 0))

    if use_vmem_table:
        kernel = functools.partial(
            _embed_kernel_vmem_table, scale=scale, tile_tokens=tile_tokens,
            rpt=rpt, vocab=V, seq_pad=S_pad, lane_out=lane_out)
        in_specs = [
            pl.BlockSpec(memory_space=pltpu.MemorySpace.VMEM),  # whole table resident in VMEM
            pe_spec,
        ]
        scratch = [pltpu.VMEM((tile_rows, 128), jnp.float32)]
        rows_bytes = tile_rows * 128 * 4
        vmem_need = int(table_vmem_bytes + 2 * tile_rows * 128 * itemsize
                        + 2 * tile_rows * lane_out * itemsize + rows_bytes + (2 << 20))
        # Only raise the scoped-VMEM limit when the default (>=16 MiB) would not fit.
        vmem_limit = vmem_need if vmem_need > (16 << 20) else None
    else:
        kernel = functools.partial(
            _embed_kernel_hbm_gather, scale=scale, tile_tokens=tile_tokens,
            chunk_tokens=chunk_eff, rpt=rpt, vocab=V, seq_pad=S_pad, lane_out=lane_out)
        in_specs = [
            pl.BlockSpec(memory_space=pl.ANY),                  # table: raw HBM ref
            pe_spec,
        ]
        scratch = [pltpu.VMEM((tile_rows, 128), dtype),         # gathered rows (storage dtype)
                   pltpu.SemaphoreType.DMA((n_chunks,))]        # ONE aggregate sem per chunk
        vmem_limit = None

    out_flat = pl.pallas_call(
        kernel,
        out_shape=out_shape,
        grid_spec=pltpu.PrefetchScalarGridSpec(
            num_scalar_prefetch=1,                              # ids land in SMEM
            grid=(n_tiles, B),                                  # B inner -> PE slab stays resident
            in_specs=in_specs,
            out_specs=out_spec,
            scratch_shapes=scratch,
        ),
        compiler_params=pltpu.CompilerParams(
            dimension_semantics=("parallel", "parallel"),
            vmem_limit_bytes=vmem_limit),
    )(ids_flat, table_in, pe_in)

    out = out_flat.reshape(B, S_pad, rpt * lane_out)            # pure dim-merge, no data movement
    if S_pad != S:
        out = out[:, :S, :]
    if out.shape[-1] != D:
        # Only reached when D > 128 and D % 128 != 0 (keeps in-kernel stores lane-dense there).
        out = out[..., :D]
    return out


def build_positional_encoding(max_seq_len: int, embed_dim: int) -> jnp.ndarray:
    """Exact replica of the PyTorch PositionalEmbedding buffer construction
    (including its sin/cos exponent asymmetry: 2*i vs 2*(i+1)). Requires even embed_dim."""
    pe = np.zeros((max_seq_len, embed_dim), dtype=np.float32)
    for pos in range(max_seq_len):
        for i in range(0, embed_dim, 2):
            pe[pos, i] = math.sin(pos / 10000 ** (2 * i / embed_dim))
            pe[pos, i + 1] = math.cos(pos / 10000 ** (2 * (i + 1) / embed_dim))
    return jnp.asarray(pe)


if __name__ == "__main__":
    # Small shapes consistent with the module.
    vocab_size = 50
    max_seq_length = 16
    embed_dim = 32
    batch = 2
    seq = 8

    key = jax.random.PRNGKey(0)
    k_ids, k_emb = jax.random.split(key)

    # nn.Embedding weight ~ N(0, 1), deterministic init.
    embed_table = jax.random.normal(k_emb, (vocab_size, embed_dim), dtype=jnp.float32)
    pe_full = build_positional_encoding(max_seq_length, embed_dim)
    ids = jax.random.randint(k_ids, (batch, seq), 0, vocab_size, dtype=jnp.int32)

    # Pure-JAX reference (dropout is identity in eval mode).
    ref = embed_table[ids] * math.sqrt(embed_dim) + pe_full[:seq][None, :, :]

    # Path 1: small-vocab fast path (table resident in VMEM, direct-index gather).
    out_vmem = jax.block_until_ready(transformer_embedding(ids, embed_table, pe_full))
    np.testing.assert_allclose(np.asarray(out_vmem), np.asarray(ref), rtol=1e-5, atol=1e-5)

    # Path 2: large-vocab path (table in HBM, per-token DMA gather, chunked aggregate waits).
    out_hbm = jax.block_until_ready(
        transformer_embedding(ids, embed_table, pe_full, force_hbm_gather=True))
    np.testing.assert_allclose(np.asarray(out_hbm), np.asarray(ref), rtol=1e-5, atol=1e-5)

    # Path 3: bf16 storage for table + PE (halved gather/writeback bytes; f32 epilogue).
    table_bf16 = embed_table.astype(jnp.bfloat16)
    pe_bf16 = pe_full.astype(jnp.bfloat16)
    out_bf16 = jax.block_until_ready(transformer_embedding(ids, table_bf16, pe_bf16))
    ref_bf16 = (table_bf16.astype(jnp.float32)[ids] * math.sqrt(embed_dim)
                + pe_bf16.astype(jnp.float32)[:seq][None, :, :])
    np.testing.assert_allclose(np.asarray(out_bf16.astype(jnp.float32)),
                               np.asarray(ref_bf16), rtol=2e-2, atol=2e-2)

    print("KERNEL_OK")
</pallas_src>

<mosaic_0001>
module attributes {stable_mosaic.version = 11 : i64} {
  func.func @_embed_kernel_vmem_table(%arg0: i32, %arg1: i32, %arg2: memref<16xi32, #tpu.memory_space<smem>>, %arg3: memref<50x1x128xf32, #tpu.memory_space<vmem>>, %arg4: memref<1x8x128xf32, #tpu.memory_space<vmem>>, %arg5: memref<1x1x8x32xf32, #tpu.memory_space<vmem>>, %arg6: memref<8x128xf32, #tpu.memory_space<vmem>>) attributes {dimension_semantics = [#tpu.dimension_semantics<parallel>, #tpu.dimension_semantics<parallel>], iteration_bounds = array<i64: 1, 2>, scalar_prefetch = 1 : i64, scratch_operands = 1 : i64, tpu.core_type = #tpu.core_type<tc>, window_params = [{pipeline_mode = #tpu.pipeline_mode<synchronous>, transform_indices = @transform_0, window_bounds = array<i64: 50, 1, 128>}, {transform_indices = @transform_1, window_bounds = array<i64: 1, 8, 128>}, {transform_indices = @transform_2, window_bounds = array<i64: 1, 1, 8, 32>}]} {
    %c8_i32 = arith.constant 8 : i32
    %0 = arith.muli %arg1, %c8_i32 : i32
    %c8_i32_0 = arith.constant 8 : i32
    %1 = arith.muli %arg0, %c8_i32_0 : i32
    %2 = arith.addi %0, %1 : i32
    %c0_i32 = arith.constant 0 : i32
    %3 = arith.addi %2, %c0_i32 : i32
    %4 = arith.index_cast %3 : i32 to index
    %5 = memref.load %arg2[%4] : memref<16xi32, #tpu.memory_space<smem>>
    %c0_i32_1 = arith.constant 0 : i32
    %c49_i32 = arith.constant 49 : i32
    %6 = arith.maxsi %c0_i32_1, %5 : i32
    %7 = arith.minsi %c49_i32, %6 : i32
    %8 = arith.index_cast %7 : i32 to index
    %c0 = arith.constant 0 : index
    %c0_2 = arith.constant 0 : index
    %9 = vector.load %arg3[%8, %c0, %c0_2] : memref<50x1x128xf32, #tpu.memory_space<vmem>>, vector<1x1x128xf32>
    %10 = vector.shape_cast %9 : vector<1x1x128xf32> to vector<1x128xf32>
    %c0_3 = arith.constant 0 : index
    %c0_4 = arith.constant 0 : index
    %11 = vector.load %arg6[%c0_3, %c0_4] : memref<8x128xf32, #tpu.memory_space<vmem>>, vector<1x128xf32>
    tpu.vector_store %arg6[%c0_3, %c0_4], %10 {strides = array<i32>} : memref<8x128xf32, #tpu.memory_space<vmem>>, vector<1x128xf32>,
    %c1_i32 = arith.constant 1 : i32
    %12 = arith.addi %2, %c1_i32 : i32
    %13 = arith.index_cast %12 : i32 to index
    %14 = memref.load %arg2[%13] : memref<16xi32, #tpu.memory_space<smem>>
    %c0_i32_5 = arith.constant 0 : i32
    %c49_i32_6 = arith.constant 49 : i32
    %15 = arith.maxsi %c0_i32_5, %14 : i32
    %16 = arith.minsi %c49_i32_6, %15 : i32
    %17 = arith.index_cast %16 : i32 to index
    %c0_7 = arith.constant 0 : index
    %c0_8 = arith.constant 0 : index
    %18 = vector.load %arg3[%17, %c0_7, %c0_8] : memref<50x1x128xf32, #tpu.memory_space<vmem>>, vector<1x1x128xf32>
    %19 = vector.shape_cast %18 : vector<1x1x128xf32> to vector<1x128xf32>
    %c1 = arith.constant 1 : index
    %c0_9 = arith.constant 0 : index
    %20 = vector.load %arg6[%c1, %c0_9] : memref<8x128xf32, #tpu.memory_space<vmem>>, vector<1x128xf32>
    tpu.vector_store %arg6[%c1, %c0_9], %19 {strides = array<i32>} : memref<8x128xf32, #tpu.memory_space<vmem>>, vector<1x128xf32>,
    %c2_i32 = arith.constant 2 : i32
    %21 = arith.addi %2, %c2_i32 : i32
    %22 = arith.index_cast %21 : i32 to index
    %23 = memref.load %arg2[%22] : memref<16xi32, #tpu.memory_space<smem>>
    %c0_i32_10 = arith.constant 0 : i32
    %c49_i32_11 = arith.constant 49 : i32
    %24 = arith.maxsi %c0_i32_10, %23 : i32
    %25 = arith.minsi %c49_i32_11, %24 : i32
    %26 = arith.index_cast %25 : i32 to index
    %c0_12 = arith.constant 0 : index
    %c0_13 = arith.constant 0 : index
    %27 = vector.load %arg3[%26, %c0_12, %c0_13] : memref<50x1x128xf32, #tpu.memory_space<vmem>>, vector<1x1x128xf32>
    %28 = vector.shape_cast %27 : vector<1x1x128xf32> to vector<1x128xf32>
    %c2 = arith.constant 2 : index
    %c0_14 = arith.constant 0 : index
    %29 = vector.load %arg6[%c2, %c0_14] : memref<8x128xf32, #tpu.memory_space<vmem>>, vector<1x128xf32>
    tpu.vector_store %arg6[%c2, %c0_14], %28 {strides = array<i32>} : memref<8x128xf32, #tpu.memory_space<vmem>>, vector<1x128xf32>,
    %c3_i32 = arith.constant 3 : i32
    %30 = arith.addi %2, %c3_i32 : i32
    %31 = arith.index_cast %30 : i32 to index
    %32 = memref.load %arg2[%31] : memref<16xi32, #tpu.memory_space<smem>>
    %c0_i32_15 = arith.constant 0 : i32
    %c49_i32_16 = arith.constant 49 : i32
    %33 = arith.maxsi %c0_i32_15, %32 : i32
    %34 = arith.minsi %c49_i32_16, %33 : i32
    %35 = arith.index_cast %34 : i32 to index
    %c0_17 = arith.constant 0 : index
    %c0_18 = arith.constant 0 : index
    %36 = vector.load %arg3[%35, %c0_17, %c0_18] : memref<50x1x128xf32, #tpu.memory_space<vmem>>, vector<1x1x128xf32>
    %37 = vector.shape_cast %36 : vector<1x1x128xf32> to vector<1x128xf32>
    %c3 = arith.constant 3 : index
    %c0_19 = arith.constant 0 : index
    %38 = vector.load %arg6[%c3, %c0_19] : memref<8x128xf32, #tpu.memory_space<vmem>>, vector<1x128xf32>
    tpu.vector_store %arg6[%c3, %c0_19], %37 {strides = array<i32>} : memref<8x128xf32, #tpu.memory_space<vmem>>, vector<1x128xf32>,
    %c4_i32 = arith.constant 4 : i32
    %39 = arith.addi %2, %c4_i32 : i32
    %40 = arith.index_cast %39 : i32 to index
    %41 = memref.load %arg2[%40] : memref<16xi32, #tpu.memory_space<smem>>
    %c0_i32_20 = arith.constant 0 : i32
    %c49_i32_21 = arith.constant 49 : i32
    %42 = arith.maxsi %c0_i32_20, %41 : i32
    %43 = arith.minsi %c49_i32_21, %42 : i32
    %44 = arith.index_cast %43 : i32 to index
    %c0_22 = arith.constant 0 : index
    %c0_23 = arith.constant 0 : index
    %45 = vector.load %arg3[%44, %c0_22, %c0_23] : memref<50x1x128xf32, #tpu.memory_space<vmem>>, vector<1x1x128xf32>
    %46 = vector.shape_cast %45 : vector<1x1x128xf32> to vector<1x128xf32>
    %c4 = arith.constant 4 : index
    %c0_24 = arith.constant 0 : index
    %47 = vector.load %arg6[%c4, %c0_24] : memref<8x128xf32, #tpu.memory_space<vmem>>, vector<1x128xf32>
    tpu.vector_store %arg6[%c4, %c0_24], %46 {strides = array<i32>} : memref<8x128xf32, #tpu.memory_space<vmem>>, vector<1x128xf32>,
    %c5_i32 = arith.constant 5 : i32
    %48 = arith.addi %2, %c5_i32 : i32
    %49 = arith.index_cast %48 : i32 to index
    %50 = memref.load %arg2[%49] : memref<16xi32, #tpu.memory_space<smem>>
    %c0_i32_25 = arith.constant 0 : i32
    %c49_i32_26 = arith.constant 49 : i32
    %51 = arith.maxsi %c0_i32_25, %50 : i32
    %52 = arith.minsi %c49_i32_26, %51 : i32
    %53 = arith.index_cast %52 : i32 to index
    %c0_27 = arith.constant 0 : index
    %c0_28 = arith.constant 0 : index
    %54 = vector.load %arg3[%53, %c0_27, %c0_28] : memref<50x1x128xf32, #tpu.memory_space<vmem>>, vector<1x1x128xf32>
    %55 = vector.shape_cast %54 : vector<1x1x128xf32> to vector<1x128xf32>
    %c5 = arith.constant 5 : index
    %c0_29 = arith.constant 0 : index
    %56 = vector.load %arg6[%c5, %c0_29] : memref<8x128xf32, #tpu.memory_space<vmem>>, vector<1x128xf32>
    tpu.vector_store %arg6[%c5, %c0_29], %55 {strides = array<i32>} : memref<8x128xf32, #tpu.memory_space<vmem>>, vector<1x128xf32>,
    %c6_i32 = arith.constant 6 : i32
    %57 = arith.addi %2, %c6_i32 : i32
    %58 = arith.index_cast %57 : i32 to index
    %59 = memref.load %arg2[%58] : memref<16xi32, #tpu.memory_space<smem>>
    %c0_i32_30 = arith.constant 0 : i32
    %c49_i32_31 = arith.constant 49 : i32
    %60 = arith.maxsi %c0_i32_30, %59 : i32
    %61 = arith.minsi %c49_i32_31, %60 : i32
    %62 = arith.index_cast %61 : i32 to index
    %c0_32 = arith.constant 0 : index
    %c0_33 = arith.constant 0 : index
    %63 = vector.load %arg3[%62, %c0_32, %c0_33] : memref<50x1x128xf32, #tpu.memory_space<vmem>>, vector<1x1x128xf32>
    %64 = vector.shape_cast %63 : vector<1x1x128xf32> to vector<1x128xf32>
    %c6 = arith.constant 6 : index
    %c0_34 = arith.constant 0 : index
    %65 = vector.load %arg6[%c6, %c0_34] : memref<8x128xf32, #tpu.memory_space<vmem>>, vector<1x128xf32>
    tpu.vector_store %arg6[%c6, %c0_34], %64 {strides = array<i32>} : memref<8x128xf32, #tpu.memory_space<vmem>>, vector<1x128xf32>,
    %c7_i32 = arith.constant 7 : i32
    %66 = arith.addi %2, %c7_i32 : i32
    %67 = arith.index_cast %66 : i32 to index
    %68 = memref.load %arg2[%67] : memref<16xi32, #tpu.memory_space<smem>>
    %c0_i32_35 = arith.constant 0 : i32
    %c49_i32_36 = arith.constant 49 : i32
    %69 = arith.maxsi %c0_i32_35, %68 : i32
    %70 = arith.minsi %c49_i32_36, %69 : i32
    %71 = arith.index_cast %70 : i32 to index
    %c0_37 = arith.constant 0 : index
    %c0_38 = arith.constant 0 : index
    %72 = vector.load %arg3[%71, %c0_37, %c0_38] : memref<50x1x128xf32, #tpu.memory_space<vmem>>, vector<1x1x128xf32>
    %73 = vector.shape_cast %72 : vector<1x1x128xf32> to vector<1x128xf32>
    %c7 = arith.constant 7 : index
    %c0_39 = arith.constant 0 : index
    %74 = vector.load %arg6[%c7, %c0_39] : memref<8x128xf32, #tpu.memory_space<vmem>>, vector<1x128xf32>
    tpu.vector_store %arg6[%c7, %c0_39], %73 {strides = array<i32>} : memref<8x128xf32, #tpu.memory_space<vmem>>, vector<1x128xf32>,
    %c0_40 = arith.constant 0 : index
    %c0_41 = arith.constant 0 : index
    %75 = vector.load %arg6[%c0_40, %c0_41] : memref<8x128xf32, #tpu.memory_space<vmem>>, vector<8x128xf32>
    %c0_42 = arith.constant 0 : index
    %c0_43 = arith.constant 0 : index
    %c0_44 = arith.constant 0 : index
    %76 = vector.load %arg4[%c0_42, %c0_43, %c0_44] : memref<1x8x128xf32, #tpu.memory_space<vmem>>, vector<1x8x128xf32>
    %77 = vector.shape_cast %76 : vector<1x8x128xf32> to vector<8x128xf32>
    %cst = arith.constant 5.65685415 : f32
    %78 = vector.broadcast %cst : f32 to vector<8x128xf32>
    %79 = arith.mulf %75, %78 : vector<8x128xf32>
    %80 = arith.addf %79, %77 : vector<8x128xf32>
    %81 = vector.extract_strided_slice %80 {offsets = [0, 0], sizes = [8, 32], strides = [1, 1]} : vector<8x128xf32> to vector<8x32xf32>
    %c0_45 = arith.constant 0 : index
    %c0_46 = arith.constant 0 : index
    %c0_47 = arith.constant 0 : index
    %c0_48 = arith.constant 0 : index
    %82 = vector.load %arg5[%c0_45, %c0_46, %c0_47, %c0_48] : memref<1x1x8x32xf32, #tpu.memory_space<vmem>>, vector<1x1x8x32xf32>
    %83 = vector.shape_cast %82 : vector<1x1x8x32xf32> to vector<8x32xf32>
    %84 = vector.shape_cast %81 : vector<8x32xf32> to vector<1x1x8x32xf32>
    tpu.vector_store %arg5[%c0_45, %c0_46, %c0_47, %c0_48], %84 {strides = array<i32>} : memref<1x1x8x32xf32, #tpu.memory_space<vmem>>, vector<1x1x8x32xf32>,
    return
  }
  func.func @transform_0(%arg0: i32, %arg1: i32, %arg2: memref<16xi32, #tpu.memory_space<smem>>) -> (i32, i32, i32) {
    %c0_i32 = arith.constant 0 : i32
    %c0_i32_0 = arith.constant 0 : i32
    %c0_i32_1 = arith.constant 0 : i32
    %c0_i32_2 = arith.constant 0 : i32
    return %c0_i32, %c0_i32_0, %c0_i32_1 : i32, i32, i32
  }
  func.func @transform_1(%arg0: i32, %arg1: i32, %arg2: memref<16xi32, #tpu.memory_space<smem>>) -> (i32, i32, i32) {
    %c0_i32 = arith.constant 0 : i32
    %c0_i32_0 = arith.constant 0 : i32
    %c0_i32_1 = arith.constant 0 : i32
    return %arg0, %c0_i32, %c0_i32_0 : i32, i32, i32
  }
  func.func @transform_2(%arg0: i32, %arg1: i32, %arg2: memref<16xi32, #tpu.memory_space<smem>>) -> (i32, i32, i32, i32) {
    %c0_i32 = arith.constant 0 : i32
    %c0_i32_0 = arith.constant 0 : i32
    %c0_i32_1 = arith.constant 0 : i32
    return %arg1, %arg0, %c0_i32, %c0_i32_0 : i32, i32, i32, i32
  }
}

</mosaic_0001>

<bundles_post_ra>
// kernel: tpu_custom_call.1
= control target key start
LH: loop header
LB: loop body
LE: loop exit
PB: predicated region body
PF: predicated region fallthrough
CT: control target
= control target key end

     0   :  { %s680_s15 = smov [#allocation4]   ;;  %s856_s0 = inlined_call_operand.hbm [shape: s32[16], index: 0, kind: input, shape index: {}]   ;;  %s857_s1 = inlined_call_operand.hbm [shape: f32[50,1,128], index: 1, kind: input, shape index: {}]   ;;  %s858_s2 = inlined_call_operand.hbm [shape: f32[1,8,128], index: 2, kind: input, shape index: {}]   ;;  %s859_s3 = inlined_call_operand.hbm [shape: f32[2,1,8,32], index: 3, kind: output, shape index: {}]  }
   0x1   :  { %s9_s14 = sshll.u32 %s856_s0, 4  ;;  %s10_s14 = int_to_ptr.hbm [resolvable:$true] %s9_s14 }
   0x2   :  { %12 = dma.hbm_to_smem %s10_s14, 16, %s680_s15, [#allocation3] }
   0x3   :  { %642 = dma.done.wait [#allocation3], 16 }
   0x4   :  { %643 = vsyncadd [#allocation3], 4294967280 }
   0x5   :  { %15 = sfence }
   0x6   :  { %16 = vsyncpa [#allocation6], 0 }
   0x7   :  { %17 = vsyncpa [#allocation9], 0 }
   0x8   :  { %18 = vsyncpa [#allocation7], 0 }
   0x9   :  { %20 = vsyncpa [#allocation7 + $0x1], 0  ;;  %s708_s16 = smov 0   ;;  %s710_s17 = smov 0  }
   0xa   :  { %s712_s18 = smov 0   ;;  %s714_s19 = smov 0  }
   0xb   :  { %s716_s20 = smov 0   ;;  %s718_s0 = smov 0  }
   0xc LB: > { %s369_s21 = sadd.s32 4294967295, %s678_s0   ;;  %s370_s22 = sadd.s32 4294967294, %s678_s0   ;;  %s678_s0 = sphi %s718_s0, %s26_s0   ;;  %s674_s20 = sphi %s716_s20, %s868_s20   ;;  %s670_s19 = sphi %s714_s19, %s867_s19   ;;  %s666_s18 = sphi %s712_s18, %s866_s18   ;;  %s662_s17 = sphi %s710_s17, %s865_s17   ;;  %s658_s16 = sphi %s708_s16, %s864_s16  }
   0xd   : > { %s35_s23 = sadd.s32 1, %s674_s20  ;;  %s94_s24 = sadd.s32 1, %s666_s18 }
   0xe   : > { %p36_p0 = scmp.ge.s32.totalorder %s35_s23, 2  ;;  %p104_p1 = scmp.ne.s32.totalorder %s666_s18, %s662_s17 }
   0xf   : > { %p105_p2 = scmp.eq.s32.totalorder %s369_s21, 1  ;;  %p110_p3 = scmp.ne.s32.totalorder %s662_s17, %s658_s16 }
  0x10   : > { %s870_s23 = smov (%p36_p0, %s35_s23), 0  ;;  %p111_p5 = scmp.eq.s32.totalorder %s370_s22, 1 }
  0x11   : > { %p748_p4 = por %p105_p2, %p104_p1  ;;  %s89_s26 = ssub.s32 %s674_s20, %s870_s23 }
  0x12   : > { %p371_p6 = scmp.ge.s32.totalorder %s678_s0, 1  ;;  %p92_p7 = scmp.eq.s32.totalorder %s89_s26, 0 }
  0x13   : > { %p755_p8 = por %p111_p5, %p110_p3  ;;  %p118_p9 = scmp.lt.s32.totalorder %s678_s0, 3 }
  0x14   : > { %s761_s28 = scalar_select %p92_p7, %s666_s18, %s94_s24  }
  0x15   : > { %p763_p10 = pnand %p371_p6, %p118_p9  ;;  %p767_p11 = scmp.eq.s32.totalorder %s369_s21, 0 }
  0x16   : > { %s129_s6 = sshll.u32 %s857_s1, 4  ;;  %s681_s7 = smov [#allocation5]   ;;  %s130_s6 = int_to_ptr.hbm [resolvable:$true] %s129_s6 }
  0x17   : > { %p449_p12 = pneg %p763_p10  ;;  %s131_s8 = sshll.u32 %s681_s7, 4  ;;  %s132_s8 = int_to_ptr.vmem [resolvable:$true] %s131_s8 }
  0x18   : > { %s146_s11 = sshll.u32 %s858_s2, 4  ;;  %s682_s12 = smov 16   ;;  %s147_s11 = int_to_ptr.hbm [resolvable:$true] %s146_s11 }
  0x19   : > { %p450_p13 = pnand %p767_p11, %p449_p12  ;;  %s683_s13 = smov 1  }
  0x1a   : > { %s684_s14 = smov [#allocation8]   ;;  %161 = sbr.rel (%p763_p10) target bundleno = 84 (0x54), region = 28 }
  0x1b   : > { %452 = dma.hbm_to_vmem [thread:$0]  (!%p450_p13), %s130_s6, 800, %s132_s8, [#allocation6], %s682_s12, %s682_s12, %s683_s13  }
  0x1c   : > { %s148_s15 = sshll.u32 %s684_s14, 4  ;;  %s149_s15 = int_to_ptr.vmem [resolvable:$true] %s148_s15 }
  0x1d   : > { %455 = dma.hbm_to_vmem [thread:$0]  (!%p450_p13), %s147_s11, 128, %s149_s15, [#allocation9]  }
  0x1f   : > { %645 = dma.done.wait (%p767_p11), [#allocation6], 800  }
  0x20   : > { %647 = vsyncadd (%p767_p11), [#allocation6], 4294966496 }
  0x21   : > { %649 = dma.done.wait (%p767_p11), [#allocation9], 128  }
  0x22   : > { %651 = vsyncadd (%p767_p11), [#allocation9], 4294967168  ;;  %s792_s21 = sshll.u32 %s670_s19, 3  ;;  %v259_v9 = vld [vmem:[#allocation8] sm:$0xff]  ;;  %vm262_vm0 = vcmask 261120  }
  0x23   : > { %s187_s22 = sld [smem:[#allocation4 + %s792_s21]]  ;;  %s195_s24 = sadd.s32 1, %s792_s21 }
  0x24   : > { %s196_s26 = sld [smem:[#allocation4 + %s195_s24]]  ;;  %s204_s29 = sadd.s32 2, %s792_s21 }
  0x25   : > { %s205_s4 = sld [smem:[#allocation4 + %s204_s29]]  ;;  %s213_s5 = sadd.s32 3, %s792_s21 }
  0x26   : > { %s798_s6 = sld [smem:[#allocation4 + %s213_s5]]  ;;  %s222_s30 = sadd.s32 4, %s792_s21 }
  0x27   : > { %s801_s7 = sld [smem:[#allocation4 + %s222_s30]]  ;;  %s231_s19 = sadd.s32 5, %s792_s21 }
  0x28   : > { %s804_s8 = sld [smem:[#allocation4 + %s231_s19]]  ;;  %s240_s9 = sadd.s32 6, %s792_s21 }
  0x29   : > { %p188_p0 = scmp.gt.s32.totalorder %s187_s22, 0  ;;  %p379_p1 = scmp.lt.s32.totalorder %s187_s22, 49 }
  0x2a   : > { %p197_p2 = scmp.gt.s32.totalorder %s196_s26, 0  ;;  %p384_p3 = scmp.lt.s32.totalorder %s196_s26, 49 }
  0x2b   : > { %s872_s22 = smov (!%p188_p0, %s187_s22), 0  ;;  %p206_p5 = scmp.gt.s32.totalorder %s205_s4, 0 }
  0x2c   : > { %s874_s26 = smov (!%p197_p2, %s196_s26), 0  ;;  %s876_s22 = smov (!%p379_p1, %s872_s22), 49 }
  0x2d   : > { %s878_s26 = smov (!%p384_p3, %s874_s26), 49  ;;  %s192_s10 = scalar_lea.vmem [#allocation5], %s876_s22 }
  0x2e   : > { %v193_v0 = vld [vmem:[%s192_s10] sm:$0x1]  ;;  %p389_p6 = scmp.lt.s32.totalorder %s205_s4, 49  ;;  %s201_s11 = scalar_lea.vmem [#allocation5], %s878_s26 }
  0x2f   : > { %194 = vst [vmem:[#allocation2] sm:$0x1] %v193_v0  ;;  %v202_v1 = vld [vmem:[%s201_s11] sm:$0x1]  ;;  %s880_s4 = smov (!%p206_p5, %s205_s4), 0  ;;  %p215_p7 = scmp.gt.s32.totalorder %s798_s6, 0 }
  0x30   : > { %203 = vst [vmem:[#allocation2 + $0x1] sm:$0x1] %v202_v1  ;;  %p394_p9 = scmp.lt.s32.totalorder %s798_s6, 49  ;;  %s882_s4 = smov (!%p389_p6, %s880_s4), 49 }
  0x31   : > { %s884_s6 = smov (!%p215_p7, %s798_s6), 0  ;;  %p224_p10 = scmp.gt.s32.totalorder %s801_s7, 0 }
  0x32   : > { %s210_s12 = scalar_lea.vmem [#allocation5], %s882_s4  ;;  %s886_s6 = smov (!%p394_p9, %s884_s6), 49 }
  0x33   : > { %v211_v2 = vld [vmem:[%s210_s12] sm:$0x1]  ;;  %s225_s13 = scalar_select %p224_p10, %s801_s7, 0 }
  0x34   : > { %212 = vst [vmem:[#allocation2 + $0x2] sm:$0x1] %v211_v2  ;;  %p399_p11 = scmp.lt.s32.totalorder %s801_s7, 49  ;;  %s219_s14 = scalar_lea.vmem [#allocation5], %s886_s6 }
  0x35   : > { %v220_v3 = vld [vmem:[%s219_s14] sm:$0x1]  ;;  %p233_p12 = scmp.gt.s32.totalorder %s804_s8, 0  ;;  %p404_p13 = scmp.lt.s32.totalorder %s804_s8, 49 }
  0x36   : > { %221 = vst [vmem:[#allocation2 + $0x3] sm:$0x1] %v220_v3  ;;  %s888_s13 = smov (!%p399_p11, %s225_s13), 49  ;;  %s241_s15 = sld [smem:[#allocation4 + %s240_s9]] }
  0x37   : > { %s890_s8 = smov (!%p233_p12, %s804_s8), 0  ;;  %s228_s22 = scalar_lea.vmem [#allocation5], %s888_s13 }
  0x38   : > { %v229_v4 = vld [vmem:[%s228_s22] sm:$0x1]  ;;  %s892_s8 = smov (!%p404_p13, %s890_s8), 49  ;;  %s249_s24 = sadd.s32 7, %s792_s21 }
  0x39   : > { %230 = vst [vmem:[#allocation2 + $0x4] sm:$0x1] %v229_v4  ;;  %s250_s26 = sld [smem:[#allocation4 + %s249_s24]]  ;;  %s237_s29 = scalar_lea.vmem [#allocation5], %s892_s8 }
  0x3a   : > { %v238_v5 = vld [vmem:[%s237_s29] sm:$0x1]  ;;  %s181_s5 = sand.u32 1, %s662_s17   ;;  %s276_s8 = scalar_lea.hbm %s859_s3, %s792_s21 }
  0x3b   : > { %239 = vst [vmem:[#allocation2 + $0x5] sm:$0x1] %v238_v5  ;;  %s377_s30 = sshll.u32 %s181_s5, 3  ;;  %s280_s11 = sshll.u32 %s276_s8, 4  ;;  %s281_s11 = int_to_ptr.hbm [resolvable:$true] %s280_s11 }
  0x3c   : > { %p242_p0 = scmp.gt.s32.totalorder %s241_s15, 0  ;;  %p409_p1 = scmp.lt.s32.totalorder %s241_s15, 49 }
  0x3d   : > { %s183_s9 = scalar_lea.vmem [#allocation10], %s377_s30  ;;  %s265_s12 = scalar_lea.sflag [#allocation7], %s181_s5 }
  0x3e   : > { %s894_s15 = smov (!%p242_p0, %s241_s15), 0  ;;  %s278_s10 = sshll.u32 %s183_s9, 4  ;;  %s279_s10 = int_to_ptr.vmem [resolvable:$true] %s278_s10 }
  0x3f   : > { %p251_p2 = scmp.gt.s32.totalorder %s250_s26, 0  ;;  %p414_p3 = scmp.lt.s32.totalorder %s250_s26, 49 }
  0x40   : > { %s896_s15 = smov (!%p409_p1, %s894_s15), 49  ;;  %s604_s13 = sshra.s32 %s281_s11, 4  ;;  %s605_s13 = int_to_ptr.hbm [resolvable:$true] %s604_s13 }
  0x41   : > { %s898_s26 = smov (!%p251_p2, %s250_s26), 0  ;;  %s246_s4 = scalar_lea.vmem [#allocation5], %s896_s15 }
  0x42   : > { %v247_v6 = vld [vmem:[%s246_s4] sm:$0x1]  ;;  %s900_s26 = smov (!%p414_p3, %s898_s26), 49  ;;  %s606_s14 = scalar_lea.hbm %s605_s13, 8 }
  0x43   : > { %248 = vst [vmem:[#allocation2 + $0x6] sm:$0x1] %v247_v6  ;;  %s255_s6 = scalar_lea.vmem [#allocation5], %s900_s26  ;;  %p607_p5 = scmp.ne.s32.totalorder %s605_s13, %s606_s14 }
  0x44   : > { %v256_v7 = vld [vmem:[%s255_s6] sm:$0x1]  ;;  %s610_s22 = scalar_lea.hbm %s859_s3, 16  ;;  %p611_p9 = scmp.lt.s32.totalorder %s605_s13, %s859_s3 }
  0x45   : > { %257 = vst [vmem:[#allocation2 + $0x7] sm:$0x1] %v256_v7  ;;  %p608_p6 = pnand %p607_p5, %p748_p4  ;;  %p612_p10 = scmp.lt.s32.totalorder %s610_s22, %s606_s14 }
  0x47   : > { %p609_p7 = pneg %p608_p6  ;;  %p613_p11 = por %p612_p10, %p611_p9 }
  0x49   : > { %p614_p12 = pnand %p613_p11, %p609_p7 }
  0x4c   : > { %v258_v8 = vld [vmem:[#allocation2] sm:$0xff] }
  0x4d   : > { %v260_v10 = vmul.f32 5.656854, %v258_v8 }
  0x4f   : > { %v261_v11 = vadd.f32 %v260_v10, %v259_v9 }
  0x51   : > { %263 = vst.msk [vmem:[%s183_s9] sm:$0xff] %vm262_vm0, %v261_v11 }
  0x52   : > { %617 = shalt.err (!%p614_p12)
}
  0x53   : > { %447 = dma.vmem_to_hbm [thread:$0]  (%p748_p4), %s279_s10, 128, %s281_s11, %s265_s12  }
  0x54 PF: > { %p464_p13 = scmp.ge.s32.totalorder %s678_s0, 2  ;;  %s292_s29 = sand.u32 1, %s658_s16  }
  0x55   : > { %s293_s4 = scalar_lea.sflag [#allocation7], %s292_s29 }
  0x56   : > { %p457_p0 = pnand %p464_p13, %p755_p8 }
  0x58   : > { %p458_p1 = pneg %p457_p0 }
  0x5a   : > { %653 = dma.done.wait (%p458_p1), %s293_s4, 128  }
  0x5b   : > { %655 = vsyncadd (%p458_p1), %s293_s4, 4294967168  ;;  %s26_s0 = sadd.s32 1, %s678_s0   ;;  %s864_s16 = smov %s662_s17 }
  0x5c   : > { %p23_p2 = scmp.ge.s32.totalorder %s26_s0, 4   ;;  %s865_s17 = smov %s666_s18 }
  0x5d   : > { %s866_s18 = smov %s761_s28  ;;  %s867_s19 = smov %s674_s20 }
  0x5e   : > { %s868_s20 = smov %s870_s23  ;;  %25 = sbr.rel (!%p23_p2) target bundleno = 12 (0xc), region = 78 }
  0x63   :  { %299 = vsyncpa [#allocation6], 1 }
  0x64   :  { %301 = vsyncpa [#allocation6 + $0x1], 1 }
  0x65   :  { %302 = vsyncpa [#allocation9], 1 }
  0x66   :  { %303 = vsyncpa [#allocation7], 1 }
  0x67   :  { %305 = vsyncpa [#allocation7 + $0x1], 1 }

</bundles_post_ra>
